<compile_context>
chip_gen: v7x
topology: tpu7x:2x2x1
jax: 0.10.0
libtpu: 0.0.40
codegen_flags: <defaults>
</compile_context>

<pallas_src>
import functools

import jax
import jax.numpy as jnp
import numpy as np
from jax import lax
from jax.experimental import pallas as pl
from jax.experimental.pallas import tpu as pltpu

WINDOW_SIZE = 11
SIGMA = 1.5
C1 = 0.01 ** 2
C2 = 0.03 ** 2


# ----------------------------- host-side constants -----------------------------

def _gaussian_1d_np(window_size: int, sigma: float) -> np.ndarray:
    x = np.arange(window_size, dtype=np.float64)
    g = np.exp(-((x - window_size // 2) ** 2) / (2.0 * sigma ** 2))
    return (g / g.sum()).astype(np.float32)


def _band_matrix_np(n: int, w1d: np.ndarray, half: int) -> np.ndarray:
    """M[a, b] = w1d[b - a + half] if |b - a| <= half else 0 (zero padding)."""
    idx = np.arange(n)
    diff = idx[None, :] - idx[:, None] + half
    mask = (diff >= 0) & (diff < w1d.shape[0])
    return np.where(mask, w1d[np.clip(diff, 0, w1d.shape[0] - 1)], 0.0).astype(np.float32)


@functools.lru_cache(maxsize=None)
def _conv_matrices(H: int, W: int, B: int, G: int):
    """Block-diagonal band matrices for the packed layout (numpy, cached)."""
    w1d = _gaussian_1d_np(WINDOW_SIZE, SIGMA)
    half = WINDOW_SIZE // 2
    mh = _band_matrix_np(H, w1d, half)          # (H, H), applied from the left
    mw = _band_matrix_np(W, w1d, half).T        # (W, W) (symmetric anyway)
    mh_block = np.kron(np.eye(B, dtype=np.float32), mh)   # (B*H, B*H)
    mw_block = np.kron(np.eye(G, dtype=np.float32), mw)   # (G*W, G*W)
    return mh_block, mw_block


def _divisors(n: int):
    return [d for d in range(1, n + 1) if n % d == 0]


def _pick_pack_factor(total: int, unit: int, target: int = 128, cap: int = 512) -> int:
    """Smallest divisor d of `total` with d*unit >= target (bounded by cap)."""
    best = 1
    for d in _divisors(total):
        if d * unit > cap:
            break
        best = d
        if d * unit >= target:
            break
    return best


# ----------------------------------- kernel -----------------------------------

def _ssim_kernel(x1_ref, x2_ref, mh_ref, mw_ref, psum_ref):
    x1 = x1_ref[...]            # (BH, GW) f32
    x2 = x2_ref[...]            # (BH, GW) f32
    mh = mh_ref[...]            # (BH, BH) block-diag band matrix
    mw = mw_ref[...]            # (GW, GW) block-diag band matrix

    def conv(x):
        # Separable gaussian "same" conv == left/right band-matrix matmuls (MXU).
        t = jnp.dot(mh, x, preferred_element_type=jnp.float32)
        return jnp.dot(t, mw, preferred_element_type=jnp.float32)

    mu1 = conv(x1)
    mu2 = conv(x2)
    e11 = conv(x1 * x1)
    e22 = conv(x2 * x2)
    e12 = conv(x1 * x2)

    mu1_sq = mu1 * mu1
    mu2_sq = mu2 * mu2
    mu1_mu2 = mu1 * mu2
    sigma1_sq = e11 - mu1_sq
    sigma2_sq = e22 - mu2_sq
    sigma12 = e12 - mu1_mu2

    ssim_map = ((2.0 * mu1_mu2 + C1) * (2.0 * sigma12 + C2)) / (
        (mu1_sq + mu2_sq + C1) * (sigma1_sq + sigma2_sq + C2)
    )

    # Per-grid-step partial sum, written lane-dense (one full vreg) so the grid
    # axis can be "parallel"; the wrapper reduces across steps.
    psum_ref[...] = jnp.full(psum_ref.shape, jnp.sum(ssim_map), dtype=jnp.float32)


# ---------------------------------- wrapper ----------------------------------

@jax.jit
def ssim_loss_pallas(outputs: jnp.ndarray, targets: jnp.ndarray) -> jnp.ndarray:
    """1 - SSIM(outputs, targets). Inputs NCHW, same shape, float32 math."""
    assert outputs.shape == targets.shape
    N, C, H, W = outputs.shape
    P = N * C

    # Lane-pack G planes (last dim -> G*W >= 128 when possible) and
    # sublane-stack B groups (matmul M dim -> B*H >= 128 when possible).
    G = _pick_pack_factor(P, W)
    num_groups = P // G
    B = _pick_pack_factor(num_groups, H)
    num_steps = num_groups // B
    if num_steps > 1 and (B * H) % 8 != 0:
        # Keep block == full array when the sublane block wouldn't be 8-aligned.
        B, num_steps = num_groups, 1
    BH, GW = B * H, G * W

    def pack(x):
        x = x.reshape(num_groups, G, H, W).astype(jnp.float32)
        x = jnp.transpose(x, (0, 2, 1, 3))       # (num_groups, H, G, W)
        return x.reshape(num_steps * BH, GW)     # groups stacked along rows

    x1 = pack(outputs.reshape(P, H, W))
    x2 = pack(targets.reshape(P, H, W))

    mh_np, mw_np = _conv_matrices(H, W, B, G)
    mh = jnp.asarray(mh_np)
    mw = jnp.asarray(mw_np)

    psums = pl.pallas_call(
        _ssim_kernel,
        out_shape=jax.ShapeDtypeStruct((num_steps, 8, 128), jnp.float32),
        grid_spec=pltpu.PrefetchScalarGridSpec(
            num_scalar_prefetch=0,
            grid=(num_steps,),
            in_specs=[
                pl.BlockSpec((BH, GW), lambda i: (i, 0)),
                pl.BlockSpec((BH, GW), lambda i: (i, 0)),
                pl.BlockSpec((BH, BH), lambda i: (0, 0)),
                pl.BlockSpec((GW, GW), lambda i: (0, 0)),
            ],
            out_specs=pl.BlockSpec((1, 8, 128), lambda i: (i, 0, 0)),
        ),
        compiler_params=pltpu.CompilerParams(
            dimension_semantics=("parallel",),
        ),
    )(x1, x2, mh, mw)

    total = jnp.float32(P * H * W)
    return 1.0 - jnp.sum(psums[:, 0, 0]) / total


# --------------------------------- reference ---------------------------------

def ssim_loss_ref(outputs: jnp.ndarray, targets: jnp.ndarray) -> jnp.ndarray:
    """Pure-JAX reference using depthwise conv (mirrors pytorch_ssim)."""
    N, C, H, W = outputs.shape
    w1d = jnp.asarray(_gaussian_1d_np(WINDOW_SIZE, SIGMA))
    win2d = jnp.outer(w1d, w1d)  # (11, 11)
    win = jnp.broadcast_to(win2d, (C, 1, WINDOW_SIZE, WINDOW_SIZE))

    def conv(x):
        return lax.conv_general_dilated(
            x, win,
            window_strides=(1, 1),
            padding=[(5, 5), (5, 5)],
            dimension_numbers=("NCHW", "OIHW", "NCHW"),
            feature_group_count=C,
        )

    x1 = outputs.astype(jnp.float32)
    x2 = targets.astype(jnp.float32)
    mu1, mu2 = conv(x1), conv(x2)
    mu1_sq, mu2_sq, mu1_mu2 = mu1 * mu1, mu2 * mu2, mu1 * mu2
    sigma1_sq = conv(x1 * x1) - mu1_sq
    sigma2_sq = conv(x2 * x2) - mu2_sq
    sigma12 = conv(x1 * x2) - mu1_mu2
    ssim_map = ((2 * mu1_mu2 + C1) * (2 * sigma12 + C2)) / (
        (mu1_sq + mu2_sq + C1) * (sigma1_sq + sigma2_sq + C2)
    )
    return 1.0 - jnp.mean(ssim_map)


if __name__ == "__main__":
    key = jax.random.PRNGKey(0)
    k1, k2 = jax.random.split(key)
    N, C, H, W = 2, 4, 16, 16
    outputs = jax.random.uniform(k1, (N, C, H, W), dtype=jnp.float32)
    targets = jax.random.uniform(k2, (N, C, H, W), dtype=jnp.float32)

    loss = jax.block_until_ready(ssim_loss_pallas(outputs, targets))
    ref = jax.block_until_ready(ssim_loss_ref(outputs, targets))

    np.testing.assert_allclose(np.asarray(loss), np.asarray(ref), rtol=1e-4, atol=1e-5)
    print("KERNEL_OK")
</pallas_src>

<mosaic_0001>
module attributes {stable_mosaic.version = 11 : i64} {
  func.func @_ssim_kernel(%arg0: i32, %arg1: memref<16x128xf32, #tpu.memory_space<vmem>>, %arg2: memref<16x128xf32, #tpu.memory_space<vmem>>, %arg3: memref<16x16xf32, #tpu.memory_space<vmem>>, %arg4: memref<128x128xf32, #tpu.memory_space<vmem>>, %arg5: memref<1x8x128xf32, #tpu.memory_space<vmem>>) attributes {dimension_semantics = [#tpu.dimension_semantics<parallel>], iteration_bounds = array<i64: 1>, scalar_prefetch = 0 : i64, scratch_operands = 0 : i64, tpu.core_type = #tpu.core_type<tc>, window_params = [{transform_indices = @transform_0, window_bounds = array<i64: 16, 128>}, {transform_indices = @transform_1, window_bounds = array<i64: 16, 128>}, {pipeline_mode = #tpu.pipeline_mode<synchronous>, transform_indices = @transform_2, window_bounds = array<i64: 16, 16>}, {pipeline_mode = #tpu.pipeline_mode<synchronous>, transform_indices = @transform_3, window_bounds = array<i64: 128, 128>}, {transform_indices = @transform_4, window_bounds = array<i64: 1, 8, 128>}]} {
    %c0 = arith.constant 0 : index
    %c0_0 = arith.constant 0 : index
    %0 = vector.load %arg1[%c0, %c0_0] : memref<16x128xf32, #tpu.memory_space<vmem>>, vector<16x128xf32>
    %c0_1 = arith.constant 0 : index
    %c0_2 = arith.constant 0 : index
    %1 = vector.load %arg2[%c0_1, %c0_2] : memref<16x128xf32, #tpu.memory_space<vmem>>, vector<16x128xf32>
    %c0_3 = arith.constant 0 : index
    %c0_4 = arith.constant 0 : index
    %2 = vector.load %arg3[%c0_3, %c0_4] : memref<16x16xf32, #tpu.memory_space<vmem>>, vector<16x16xf32>
    %c0_5 = arith.constant 0 : index
    %c0_6 = arith.constant 0 : index
    %3 = vector.load %arg4[%c0_5, %c0_6] : memref<128x128xf32, #tpu.memory_space<vmem>>, vector<128x128xf32>
    %cst = arith.constant dense<0.000000e+00> : vector<16x128xf32>
    %4 = tpu.matmul %2, %0, %cst {dimension_numbers = #tpu.dot_dimension_numbers<[1], [0], [0], [1], [0, 0, 1, 1], [], []>} : vector<16x16xf32>, vector<16x128xf32>, vector<16x128xf32> -> vector<16x128xf32>
    %cst_7 = arith.constant dense<0.000000e+00> : vector<16x128xf32>
    %5 = tpu.matmul %4, %3, %cst_7 {dimension_numbers = #tpu.dot_dimension_numbers<[1], [0], [0], [1], [0, 0, 1, 1], [], []>} : vector<16x128xf32>, vector<128x128xf32>, vector<16x128xf32> -> vector<16x128xf32>
    %cst_8 = arith.constant dense<0.000000e+00> : vector<16x128xf32>
    %6 = tpu.matmul %2, %1, %cst_8 {dimension_numbers = #tpu.dot_dimension_numbers<[1], [0], [0], [1], [0, 0, 1, 1], [], []>} : vector<16x16xf32>, vector<16x128xf32>, vector<16x128xf32> -> vector<16x128xf32>
    %cst_9 = arith.constant dense<0.000000e+00> : vector<16x128xf32>
    %7 = tpu.matmul %6, %3, %cst_9 {dimension_numbers = #tpu.dot_dimension_numbers<[1], [0], [0], [1], [0, 0, 1, 1], [], []>} : vector<16x128xf32>, vector<128x128xf32>, vector<16x128xf32> -> vector<16x128xf32>
    %8 = arith.mulf %0, %0 : vector<16x128xf32>
    %cst_10 = arith.constant dense<0.000000e+00> : vector<16x128xf32>
    %9 = tpu.matmul %2, %8, %cst_10 {dimension_numbers = #tpu.dot_dimension_numbers<[1], [0], [0], [1], [0, 0, 1, 1], [], []>} : vector<16x16xf32>, vector<16x128xf32>, vector<16x128xf32> -> vector<16x128xf32>
    %cst_11 = arith.constant dense<0.000000e+00> : vector<16x128xf32>
    %10 = tpu.matmul %9, %3, %cst_11 {dimension_numbers = #tpu.dot_dimension_numbers<[1], [0], [0], [1], [0, 0, 1, 1], [], []>} : vector<16x128xf32>, vector<128x128xf32>, vector<16x128xf32> -> vector<16x128xf32>
    %11 = arith.mulf %1, %1 : vector<16x128xf32>
    %cst_12 = arith.constant dense<0.000000e+00> : vector<16x128xf32>
    %12 = tpu.matmul %2, %11, %cst_12 {dimension_numbers = #tpu.dot_dimension_numbers<[1], [0], [0], [1], [0, 0, 1, 1], [], []>} : vector<16x16xf32>, vector<16x128xf32>, vector<16x128xf32> -> vector<16x128xf32>
    %cst_13 = arith.constant dense<0.000000e+00> : vector<16x128xf32>
    %13 = tpu.matmul %12, %3, %cst_13 {dimension_numbers = #tpu.dot_dimension_numbers<[1], [0], [0], [1], [0, 0, 1, 1], [], []>} : vector<16x128xf32>, vector<128x128xf32>, vector<16x128xf32> -> vector<16x128xf32>
    %14 = arith.mulf %0, %1 : vector<16x128xf32>
    %cst_14 = arith.constant dense<0.000000e+00> : vector<16x128xf32>
    %15 = tpu.matmul %2, %14, %cst_14 {dimension_numbers = #tpu.dot_dimension_numbers<[1], [0], [0], [1], [0, 0, 1, 1], [], []>} : vector<16x16xf32>, vector<16x128xf32>, vector<16x128xf32> -> vector<16x128xf32>
    %cst_15 = arith.constant dense<0.000000e+00> : vector<16x128xf32>
    %16 = tpu.matmul %15, %3, %cst_15 {dimension_numbers = #tpu.dot_dimension_numbers<[1], [0], [0], [1], [0, 0, 1, 1], [], []>} : vector<16x128xf32>, vector<128x128xf32>, vector<16x128xf32> -> vector<16x128xf32>
    %17 = arith.mulf %5, %5 : vector<16x128xf32>
    %18 = arith.mulf %7, %7 : vector<16x128xf32>
    %19 = arith.mulf %5, %7 : vector<16x128xf32>
    %20 = arith.subf %10, %17 : vector<16x128xf32>
    %21 = arith.subf %13, %18 : vector<16x128xf32>
    %22 = arith.subf %16, %19 : vector<16x128xf32>
    %cst_16 = arith.constant 2.000000e+00 : f32
    %23 = vector.broadcast %cst_16 : f32 to vector<16x128xf32>
    %24 = arith.mulf %23, %19 : vector<16x128xf32>
    %cst_17 = arith.constant 9.99999974E-5 : f32
    %25 = vector.broadcast %cst_17 : f32 to vector<16x128xf32>
    %26 = arith.addf %24, %25 : vector<16x128xf32>
    %cst_18 = arith.constant 2.000000e+00 : f32
    %27 = vector.broadcast %cst_18 : f32 to vector<16x128xf32>
    %28 = arith.mulf %27, %22 : vector<16x128xf32>
    %cst_19 = arith.constant 8.99999984E-4 : f32
    %29 = vector.broadcast %cst_19 : f32 to vector<16x128xf32>
    %30 = arith.addf %28, %29 : vector<16x128xf32>
    %31 = arith.mulf %26, %30 : vector<16x128xf32>
    %32 = arith.addf %17, %18 : vector<16x128xf32>
    %cst_20 = arith.constant 9.99999974E-5 : f32
    %33 = vector.broadcast %cst_20 : f32 to vector<16x128xf32>
    %34 = arith.addf %32, %33 : vector<16x128xf32>
    %35 = arith.addf %20, %21 : vector<16x128xf32>
    %cst_21 = arith.constant 8.99999984E-4 : f32
    %36 = vector.broadcast %cst_21 : f32 to vector<16x128xf32>
    %37 = arith.addf %35, %36 : vector<16x128xf32>
    %38 = arith.mulf %34, %37 : vector<16x128xf32>
    %39 = arith.divf %31, %38 : vector<16x128xf32>
    %40 = vector.shape_cast %39 : vector<16x128xf32> to vector<1x16x128xf32>
    %cst_22 = arith.constant dense<0.000000e+00> : vector<1xf32>
    %41 = vector.multi_reduction <add>, %40, %cst_22 [1, 2] : vector<1x16x128xf32> to vector<1xf32>
    %42 = vector.shape_cast %41 : vector<1xf32> to vector<1x1x1xf32>
    %43 = vector.extract %42[0, 0, 0] : f32 from vector<1x1x1xf32>
    %44 = vector.broadcast %43 : f32 to vector<1x8x128xf32>
    %c0_23 = arith.constant 0 : index
    %c0_24 = arith.constant 0 : index
    %c0_25 = arith.constant 0 : index
    %45 = vector.load %arg5[%c0_23, %c0_24, %c0_25] : memref<1x8x128xf32, #tpu.memory_space<vmem>>, vector<1x8x128xf32>
    tpu.vector_store %arg5[%c0_23, %c0_24, %c0_25], %44 {strides = array<i32>} : memref<1x8x128xf32, #tpu.memory_space<vmem>>, vector<1x8x128xf32>,
    return
  }
  func.func @transform_0(%arg0: i32) -> (i32, i32) {
    %c0_i32 = arith.constant 0 : i32
    %c0_i32_0 = arith.constant 0 : i32
    return %arg0, %c0_i32 : i32, i32
  }
  func.func @transform_1(%arg0: i32) -> (i32, i32) {
    %c0_i32 = arith.constant 0 : i32
    %c0_i32_0 = arith.constant 0 : i32
    return %arg0, %c0_i32 : i32, i32
  }
  func.func @transform_2(%arg0: i32) -> (i32, i32) {
    %c0_i32 = arith.constant 0 : i32
    %c0_i32_0 = arith.constant 0 : i32
    %c0_i32_1 = arith.constant 0 : i32
    return %c0_i32, %c0_i32_0 : i32, i32
  }
  func.func @transform_3(%arg0: i32) -> (i32, i32) {
    %c0_i32 = arith.constant 0 : i32
    %c0_i32_0 = arith.constant 0 : i32
    %c0_i32_1 = arith.constant 0 : i32
    return %c0_i32, %c0_i32_0 : i32, i32
  }
  func.func @transform_4(%arg0: i32) -> (i32, i32, i32) {
    %c0_i32 = arith.constant 0 : i32
    %c0_i32_0 = arith.constant 0 : i32
    %c0_i32_1 = arith.constant 0 : i32
    return %arg0, %c0_i32, %c0_i32_0 : i32, i32, i32
  }
}

</mosaic_0001>

<bundles_post_ra>
// kernel: ssim_loss_pallas.1
= control target key start
LH: loop header
LB: loop body
LE: loop exit
PB: predicated region body
PF: predicated region fallthrough
CT: control target
= control target key end

     0   :  { %vm39_vm0 = vcmask 130048   ;;  %s1608_s0 = inlined_call_operand.vmem [shape: f32[16,128], index: 0, kind: input, shape index: {}]   ;;  %s1609_s2 = inlined_call_operand.vmem [shape: f32[16,16], index: 2, kind: input, shape index: {}]   ;;  %s1610_s1 = inlined_call_operand.vmem [shape: f32[16,128], index: 1, kind: input, shape index: {}]   ;;  %s1611_s3 = inlined_call_operand.vmem [shape: f32[128,128], index: 3, kind: input, shape index: {}]   ;;  %s1612_s4 = inlined_call_operand.vmem [shape: f32[1,8,128], index: 4, kind: output, shape index: {}]  }
   0x1   :  { %v1398_v0 = vld [vmem:[%s1608_s0] sm:$0xff]  ;;  %v1403_v1 = vld [vmem:[%s1608_s0 + $0x8] sm:$0xff]  ;;  %v25_v9 = vld [vmem:[%s1611_s3 + $0x10] sm:$0xff] }
   0x2   :  { %v1408_v2 = vld [vmem:[%s1609_s2] sm:$0xff]  ;;  %v1184_v3 = vpack.c.bf16 %v1403_v1, %v1398_v0  ;;  %v1422_v5 = vld [vmem:[%s1610_s1 + $0x8] sm:$0xff]  ;;  %v26_v11 = vld [vmem:[%s1611_s3 + $0x18] sm:$0xff]  ;;  %v346_v32 = vmul.f32 %v1398_v0, %v1398_v0  ;;  %v347_v33 = vmul.f32 %v1403_v1, %v1403_v1 }
   0x3   :  { %978 = vmatprep.mubr.msk.f32.mxu0 %vm39_vm0, %v1408_v2  ;;  %v1417_v4 = vld [vmem:[%s1610_s1] sm:$0xff]  ;;  %v24_v8 = vld [vmem:[%s1611_s3 + $0x8] sm:$0xff]  ;;  %v1445_v13 = vpack.c.bf16 %v26_v11, %v25_v9  ;;  %v29_v17 = vld [vmem:[%s1611_s3 + $0x30] sm:$0xff]  ;;  %v499_v38 = vmul.f32 %v1422_v5, %v1422_v5  ;;  %v651_v43 = vmul.f32 %v1422_v5, %v1403_v1 }
   0x4   :  { %v1220_v6 = vpack.c.bf16 %v1422_v5, %v1417_v4  ;;  %v23_v7 = vld [vmem:[%s1611_s3] sm:$0xff]  ;;  %1185 = vmatprep.subr.bf16.mxu0 %v1184_v3  ;;  %v1443_v12 = vld [vmem:[%s1609_s2 + $0x8] sm:$0xff]  ;;  %v30_v18 = vld [vmem:[%s1611_s3 + $0x38] sm:$0xff]  ;;  %v1256_v34 = vpack.c.bf16 %v347_v33, %v346_v32  ;;  %v498_v37 = vmul.f32 %v1417_v4, %v1417_v4  ;;  %v650_v42 = vmul.f32 %v1417_v4, %v1398_v0 }
   0x5   :  { %v1435_v10 = vpack.c.bf16 %v24_v8, %v23_v7  ;;  %1187 = vmatpush3.bf16.msra.mxu0 %v1184_v3  ;;  %v27_v14 = vld [vmem:[%s1611_s3 + $0x20] sm:$0xff]  ;;  %v28_v15 = vld [vmem:[%s1611_s3 + $0x28] sm:$0xff]  ;;  %v1473_v19 = vpack.c.bf16 %v30_v18, %v29_v17  ;;  %v33_v23 = vld [vmem:[%s1611_s3 + $0x50] sm:$0xff] }
   0x6   :  { %1221 = vmatprep.subr.bf16.mxu0 %v1220_v6  ;;  %v1458_v16 = vpack.c.bf16 %v28_v15, %v27_v14  ;;  %v31_v20 = vld [vmem:[%s1611_s3 + $0x40] sm:$0xff]  ;;  %v32_v21 = vld [vmem:[%s1611_s3 + $0x48] sm:$0xff]  ;;  %v34_v24 = vld [vmem:[%s1611_s3 + $0x58] sm:$0xff]  ;;  %v1292_v41 = vpack.c.bf16 %v499_v38, %v498_v37  ;;  %v1328_v44 = vpack.c.bf16 %v651_v43, %v650_v42 }
   0x7   :  { %1189 = vmatprep.subr.bf16.mxu1 %v1435_v10  ;;  %v1485_v22 = vpack.c.bf16 %v32_v21, %v31_v20  ;;  %v1497_v25 = vpack.c.bf16 %v34_v24, %v33_v23  ;;  %v35_v26 = vld [vmem:[%s1611_s3 + $0x60] sm:$0xff]  ;;  %v36_v27 = vld [vmem:[%s1611_s3 + $0x68] sm:$0xff]  ;;  %v37_v29 = vld [vmem:[%s1611_s3 + $0x70] sm:$0xff] }
   0x8   :  { %1191 = vmatpush3.bf16.msra.mxu1 %v1435_v10  ;;  %979 = vmatmul.mubr.msk.f32.vlgmr.msra.gmra.mrb[0].mxu0 %vm39_vm0, %v1443_v12  ;;  %v1509_v28 = vpack.c.bf16 %v36_v27, %v35_v26  ;;  %v38_v30 = vld [vmem:[%s1611_s3 + $0x78] sm:$0xff] }
   0x9   :  { %1193 = vmatprep.subr.bf16.mxu1 %v1445_v13  ;;  %1223 = vmatpush3.bf16.msra.mxu0 %v1220_v6  ;;  %v1521_v31 = vpack.c.bf16 %v38_v30, %v37_v29 }
   0xa   :  { %1020 = vmatprep.mubr.msk.f32.mxu0 %vm39_vm0, %v1408_v2  ;;  %1225 = vmatprep.subr.bf16.mxu0 %v1435_v10 }
   0xc   :  { %1195 = vmatpush3.bf16.msra.mxu1 %v1445_v13  ;;  %1021 = vmatmul.mubr.msk.f32.vlgmr.msra.gmra.mrb[2].mxu0 %vm39_vm0, %v1443_v12 }
   0xd   :  { %1197 = vmatprep.subr.bf16.mxu1 %v1458_v16  ;;  %1227 = vmatpush3.bf16.msra.mxu0 %v1435_v10 }
   0xe   :  { %1229 = vmatprep.subr.bf16.mxu0 %v1445_v13 }
  0x10   :  { %1199 = vmatpush3.bf16.msra.mxu1 %v1458_v16 }
  0x11   :  { %1201 = vmatprep.subr.bf16.mxu1 %v1473_v19  ;;  %1231 = vmatpush3.bf16.msra.mxu0 %v1445_v13 }
  0x12   :  { %1233 = vmatprep.subr.bf16.mxu0 %v1458_v16 }
  0x14   :  { %1203 = vmatpush3.bf16.msra.mxu1 %v1473_v19 }
  0x15   :  { %1205 = vmatprep.subr.bf16.mxu1 %v1485_v22  ;;  %1235 = vmatpush3.bf16.msra.mxu0 %v1458_v16 }
  0x16   :  { %1237 = vmatprep.subr.bf16.mxu0 %v1473_v19 }
  0x18   :  { %1207 = vmatpush3.bf16.msra.mxu1 %v1485_v22 }
  0x19   :  { %1209 = vmatprep.subr.bf16.mxu1 %v1497_v25  ;;  %1239 = vmatpush3.bf16.msra.mxu0 %v1473_v19 }
  0x1a   :  { %1241 = vmatprep.subr.bf16.mxu0 %v1485_v22 }
  0x1c   :  { %1211 = vmatpush3.bf16.msra.mxu1 %v1497_v25 }
  0x1d   :  { %1213 = vmatprep.subr.bf16.mxu1 %v1509_v28  ;;  %1243 = vmatpush3.bf16.msra.mxu0 %v1485_v22 }
  0x1e   :  { %1245 = vmatprep.subr.bf16.mxu0 %v1497_v25 }
  0x20   :  { %1215 = vmatpush3.bf16.msra.mxu1 %v1509_v28 }
  0x21   :  { %1217 = vmatprep.subr.bf16.mxu1 %v1521_v31  ;;  %1247 = vmatpush3.bf16.msra.mxu0 %v1497_v25 }
  0x22   :  { %1249 = vmatprep.subr.bf16.mxu0 %v1509_v28 }
  0x24   :  { %1219 = vmatpush3.bf16.msra.mxu1 %v1521_v31 }
  0x25   :  { %1261 = vmatprep.subr.bf16.mxu1 %v1435_v10  ;;  %1251 = vmatpush3.bf16.msra.mxu0 %v1509_v28 }
  0x26   :  { %1253 = vmatprep.subr.bf16.mxu0 %v1521_v31 }
  0x29   :  { %1255 = vmatpush3.bf16.msra.mxu0 %v1521_v31 }
  0x2a   :  { %1257 = vmatprep.subr.bf16.mxu0 %v1256_v34 }
  0xdb   :  { %v980_v35 = vpop.f32.mrb[0].mxu0 }
  0xdc   :  { %v112_v36 = vpop.f32.mrb[1].mxu0 }
  0xdd   :  { %1013 = vmatprep.mubr.f32.mxu1 %v112_v36 }
  0xde   :  { %1014 = vmatmul.mubr.f32.vlgmr.msra.gmra.mrb[0].mxu1 %v980_v35 }
  0xdf   :  { %v1022_v39 = vpop.f32.mrb[2].mxu0  ;;  %1263 = vmatpush3.bf16.msra.mxu1 %v1435_v10 }
  0xe0   :  { %v262_v40 = vpop.f32.mrb[3].mxu0  ;;  %1265 = vmatprep.subr.bf16.mxu1 %v1445_v13 }
  0xe1   :  { %1055 = vmatprep.mubr.f32.mxu0 %v262_v40 }
  0xe2   :  { %1056 = vmatmul.mubr.f32.vlgmr.msra.gmra.mrb[4].mxu0 %v1022_v39 }
  0xe3   :  { %1259 = vmatpush3.bf16.msra.mxu0 %v1256_v34  ;;  %1062 = vmatprep.mubr.msk.f32.mxu0 %vm39_vm0, %v1408_v2 }
  0xe4   :  { %1293 = vmatprep.subr.bf16.mxu0 %v1292_v41  ;;  %1267 = vmatpush3.bf16.msra.mxu1 %v1445_v13 }
  0xe5   :  { %1269 = vmatprep.subr.bf16.mxu1 %v1458_v16 }
  0xe6   :  { %1063 = vmatmul.mubr.msk.f32.vlgmr.msra.gmra.mrb[6].mxu0 %vm39_vm0, %v1443_v12 }
  0xe7   :  { %1295 = vmatpush3.bf16.msra.mxu0 %v1292_v41  ;;  %1104 = vmatprep.mubr.msk.f32.mxu0 %vm39_vm0, %v1408_v2 }
  0xe8   :  { %1297 = vmatprep.subr.bf16.mxu0 %v1435_v10  ;;  %1271 = vmatpush3.bf16.msra.mxu1 %v1458_v16 }
  0xe9   :  { %1273 = vmatprep.subr.bf16.mxu1 %v1473_v19 }
  0xea   :  { %1105 = vmatmul.mubr.msk.f32.vlgmr.msra.gmra.mrb[8].mxu0 %vm39_vm0, %v1443_v12 }
  0xeb   :  { %1299 = vmatpush3.bf16.msra.mxu0 %v1435_v10 }
  0xec   :  { %1301 = vmatprep.subr.bf16.mxu0 %v1445_v13  ;;  %1275 = vmatpush3.bf16.msra.mxu1 %v1473_v19 }
  0xed   :  { %1277 = vmatprep.subr.bf16.mxu1 %v1485_v22 }
  0xef   :  { %1303 = vmatpush3.bf16.msra.mxu0 %v1445_v13 }
  0xf0   :  { %1305 = vmatprep.subr.bf16.mxu0 %v1458_v16  ;;  %1279 = vmatpush3.bf16.msra.mxu1 %v1485_v22 }
  0xf1   :  { %1281 = vmatprep.subr.bf16.mxu1 %v1497_v25 }
  0xf3   :  { %1307 = vmatpush3.bf16.msra.mxu0 %v1458_v16 }
  0xf4   :  { %1309 = vmatprep.subr.bf16.mxu0 %v1473_v19  ;;  %1283 = vmatpush3.bf16.msra.mxu1 %v1497_v25 }
  0xf5   :  { %1285 = vmatprep.subr.bf16.mxu1 %v1509_v28 }
  0xf7   :  { %1311 = vmatpush3.bf16.msra.mxu0 %v1473_v19 }
  0xf8   :  { %1313 = vmatprep.subr.bf16.mxu0 %v1485_v22  ;;  %1287 = vmatpush3.bf16.msra.mxu1 %v1509_v28 }
  0xf9   :  { %1289 = vmatprep.subr.bf16.mxu1 %v1521_v31 }
  0xfb   :  { %1315 = vmatpush3.bf16.msra.mxu0 %v1485_v22 }
  0xfc   :  { %1317 = vmatprep.subr.bf16.mxu0 %v1497_v25  ;;  %1291 = vmatpush3.bf16.msra.mxu1 %v1521_v31 }
  0xfd   :  { %1333 = vmatprep.subr.bf16.mxu1 %v1435_v10 }
  0xff   :  { %1319 = vmatpush3.bf16.msra.mxu0 %v1497_v25 }
 0x100   :  { %1321 = vmatprep.subr.bf16.mxu0 %v1509_v28 }
 0x103   :  { %1323 = vmatpush3.bf16.msra.mxu0 %v1509_v28 }
 0x104   :  { %1325 = vmatprep.subr.bf16.mxu0 %v1521_v31 }
 0x107   :  { %1327 = vmatpush3.bf16.msra.mxu0 %v1521_v31 }
 0x108   :  { %1329 = vmatprep.subr.bf16.mxu0 %v1328_v44 }
 0x1b1   :  { %v1015_v45 = vpop.f32.mrb[0].mxu1 }
 0x1b2   :  { %v187_v46 = vpop.f32.mrb[1].mxu1  ;;  %v803_v48 = vmul.f32 %v1015_v45, %v1015_v45 }
 0x1b3   :  { %v802_v52 = vmul.f32 %v187_v46, %v187_v46 }
 0x1b5   :  { %v1057_v47 = vpop.f32.mrb[4].mxu0 }
 0x1b6   :  { %v805_v49 = vmul.f32 %v1057_v47, %v1057_v47  ;;  %v807_v50 = vmul.f32 %v1057_v47, %v1015_v45  ;;  %v337_v51 = vpop.f32.mrb[5].mxu0 }
 0x1b7   :  { %v804_v53 = vmul.f32 %v337_v51, %v337_v51  ;;  %v806_v54 = vmul.f32 %v337_v51, %v187_v46 }
 0x1b8   :  { %v825_v55 = vadd.f32 %v805_v49, %v803_v48 }
 0x1b9   :  { %v824_v56 = vadd.f32 %v804_v53, %v802_v52  ;;  %v1064_v57 = vpop.f32.mrb[6].mxu0 }
 0x1ba   :  { %v414_v58 = vpop.f32.mrb[7].mxu0  ;;  %v827_v8 = vadd.f32 0.0001, %v825_v55 }
 0x1bb   :  { %1097 = vmatprep.mubr.f32.mxu1 %v414_v58  ;;  %v826_v11 = vadd.f32 0.0001, %v824_v56 }
 0x1bc   :  { %1098 = vmatmul.mubr.f32.vlgmr.msra.gmra.mrb[2].mxu1 %v1064_v57 }
 0x1bd   :  { %v1106_v59 = vpop.f32.mrb[8].mxu0  ;;  %1335 = vmatpush3.bf16.msra.mxu1 %v1435_v10 }
 0x1be   :  { %v566_v60 = vpop.f32.mrb[9].mxu0  ;;  %1337 = vmatprep.subr.bf16.mxu1 %v1445_v13 }
 0x1bf   :  { %1139 = vmatprep.mubr.f32.mxu0 %v566_v60 }
 0x1c0   :  { %1140 = vmatmul.mubr.f32.vlgmr.msra.gmra.mrb[10].mxu0 %v1106_v59 }
 0x1c1   :  { %1331 = vmatpush3.bf16.msra.mxu0 %v1328_v44  ;;  %1146 = vmatprep.mubr.msk.f32.mxu0 %vm39_vm0, %v1408_v2 }
 0x1c2   :  { %1339 = vmatpush3.bf16.msra.mxu1 %v1445_v13 }
 0x1c3   :  { %1341 = vmatprep.subr.bf16.mxu1 %v1458_v16 }
 0x1c4   :  { %1147 = vmatmul.mubr.msk.f32.vlgmr.msra.gmra.mrb[12].mxu0 %vm39_vm0, %v1443_v12 }
 0x1c6   :  { %1343 = vmatpush3.bf16.msra.mxu1 %v1458_v16  ;;  %v815_v16 = vmul.f32 2.0, %v807_v50 }
 0x1c7   :  { %1345 = vmatprep.subr.bf16.mxu1 %v1473_v19 }
 0x1c8   :  { %v817_v23 = vadd.f32 0.0001, %v815_v16 }
 0x1ca   :  { %1347 = vmatpush3.bf16.msra.mxu1 %v1473_v19  ;;  %v814_v19 = vmul.f32 2.0, %v806_v54 }
 0x1cb   :  { %1349 = vmatprep.subr.bf16.mxu1 %v1485_v22 }
 0x1ce   :  { %1351 = vmatpush3.bf16.msra.mxu1 %v1485_v22 }
 0x1cf   :  { %1353 = vmatprep.subr.bf16.mxu1 %v1497_v25 }
 0x1d2   :  { %1355 = vmatpush3.bf16.msra.mxu1 %v1497_v25  ;;  %v816_v25 = vadd.f32 0.0001, %v814_v19 }
 0x1d3   :  { %1357 = vmatprep.subr.bf16.mxu1 %v1509_v28 }
 0x1d6   :  { %1359 = vmatpush3.bf16.msra.mxu1 %v1509_v28 }
 0x1d7   :  { %1361 = vmatprep.subr.bf16.mxu1 %v1521_v31 }
 0x1da   :  { %1363 = vmatpush3.bf16.msra.mxu1 %v1521_v31 }
 0x28f   :  { %v1099_v61 = vpop.f32.mrb[2].mxu1 }
 0x290   :  { %v809_v62 = vsub.f32 %v1099_v61, %v803_v48  ;;  %v489_v63 = vpop.f32.mrb[3].mxu1 }
 0x291   :  { %v808_v0 = vsub.f32 %v489_v63, %v802_v52 }
 0x293   :  { %v1141_v1 = vpop.f32.mrb[10].mxu0 }
 0x294   :  { %v811_v2 = vsub.f32 %v1141_v1, %v805_v49  ;;  %v641_v3 = vpop.f32.mrb[11].mxu0 }
 0x295   :  { %v810_v4 = vsub.f32 %v641_v3, %v804_v53 }
 0x296   :  { %v829_v5 = vadd.f32 %v811_v2, %v809_v62 }
 0x297   :  { %v828_v6 = vadd.f32 %v810_v4, %v808_v0  ;;  %v1148_v7 = vpop.f32.mrb[12].mxu0 }
 0x298   :  { %v831_v9 = vadd.f32 0.0009, %v829_v5  ;;  %v718_v10 = vpop.f32.mrb[13].mxu0 }
 0x299   :  { %v830_v12 = vadd.f32 0.0009, %v828_v6  ;;  %1181 = vmatprep.mubr.f32.mxu1 %v718_v10 }
 0x29a   :  { %v833_v13 = vmul.f32 %v831_v9, %v827_v8  ;;  %1182 = vmatmul.mubr.f32.vlgmr.msra.gmra.mrb[4].mxu1 %v1148_v7 }
 0x29b   :  { %v832_v14 = vmul.f32 %v830_v12, %v826_v11 }
 0x29c   :  { %1366 = vrcp.f32 %v833_v13 }
 0x29d   :  { %1368 = vrcp.f32 %v832_v14 }
 0x2a6   :  { %v1367_v28 = vpop.eup %1366 }
 0x2a7   :  { %v1369_v30 = vpop.eup %1368 }
 0x36d   :  { %v1183_v15 = vpop.f32.mrb[4].mxu1 }
 0x36e   :  { %v813_v17 = vsub.f32 %v1183_v15, %v807_v50  ;;  %v793_v18 = vpop.f32.mrb[5].mxu1 }
 0x36f   :  { %v812_v20 = vsub.f32 %v793_v18, %v806_v54 }
 0x370   :  { %v819_v21 = vmul.f32 2.0, %v813_v17 }
 0x371   :  { %v818_v22 = vmul.f32 2.0, %v812_v20 }
 0x372   :  { %v821_v24 = vadd.f32 0.0009, %v819_v21 }
 0x373   :  { %v820_v26 = vadd.f32 0.0009, %v818_v22 }
 0x374   :  { %v823_v27 = vmul.f32 %v821_v24, %v817_v23 }
 0x375   :  { %v822_v29 = vmul.f32 %v820_v26, %v816_v25 }
 0x376   :  { %v837_v31 = vmul.f32 %v1367_v28, %v823_v27 }
 0x377   :  { %v835_v32 = vmul.f32 %v1369_v30, %v822_v29 }
 0x379   :  { %v838_v33 = vadd.f32 %v837_v31, %v835_v32 }
 0x37b   :  { %839 = vadd.xlane.f32.xlu0 %v838_v33 }
 0x408   :  { %v840_v34 = vpop.xlane.xlu0 %839 }
 0x409   :  { %v841_v35 = vrot.slane %v840_v34, 4 }
 0x40b   :  { %v842_v36 = vadd.f32 %v841_v35, %v840_v34 }
 0x40d   :  { %v843_v37 = vrot.slane %v842_v36, 2 }
 0x40f   :  { %v844_v38 = vadd.f32 %v843_v37, %v842_v36 }
 0x411   :  { %v845_v39 = vrot.slane %v844_v38, 1 }
 0x413   :  { %v846_v40 = vadd.f32 %v845_v39, %v844_v38 }
 0x415   :  { %1364 = vpush %v846_v40 }
 0x446   :  { %s1365_s3 = spop %1364 }
 0x447   :  { %v848_v41 = vstv %s1365_s3 }
 0x448   :  { %849 = vst [vmem:[%s1612_s4] sm:$0xff] %v848_v41 }

</bundles_post_ra>
